<compile_context>
chip_gen: v6e
topology: v6e:2x2x1
jax: 0.10.0
libtpu: 0.0.40
codegen_flags: <defaults>
</compile_context>

<pallas_src>
import functools

import jax
import jax.numpy as jnp
from jax.experimental import pallas as pl
from jax.experimental.pallas import tpu as pltpu


# ----------------------------------------------------------------------------
# Single fused kernel: patch-embed matmul -> mean/max pool -> fc
# ----------------------------------------------------------------------------
def _fused_forward_kernel(patches_ref, w_ref, wfc_ref, bfc_ref, out_ref,
                          *, bs, L, use_max_pool):
    # patches_ref : (bs*L, K)        bf16
    # w_ref       : (K, C)           bf16   (encoder patch-embed weight)
    # wfc_ref     : (C or 2C, nc)    f32    (unsplit fc weight)
    # bfc_ref     : (1, nc)          f32    (fc bias with b_embed folded in)
    # out_ref     : (bs, nc)         f32

    # One flattened MXU matmul for all (bs * n_instance) images at once.
    # No bias add here: mean/max commute with a per-column constant, the
    # encoder bias lives inside bfc_ref.
    feat = jnp.dot(patches_ref[...], w_ref[...],
                   preferred_element_type=jnp.float32)          # (bs*L, C) f32

    C = feat.shape[-1]
    feat3 = feat.reshape(bs, L, C)                              # layout-clean: L % 8 == 0

    # One reduction pass each over the instance axis (equal group sizes per
    # batch, so mean(1).mean(1) == mean over the slab, same for max).
    pooled_mean = jnp.sum(feat3, axis=1) * jnp.float32(1.0 / L)  # (bs, C)
    if use_max_pool:
        pooled_max = jnp.max(feat3, axis=1)                      # (bs, C)
        pooled = jnp.concatenate([pooled_mean, pooled_max], axis=1)  # (bs, 2C)
    else:
        pooled = pooled_mean

    # Single (bs, fc_in) @ (fc_in, nc) MXU dot + single unmasked store.
    out_ref[...] = (
        jnp.dot(pooled, wfc_ref[...], preferred_element_type=jnp.float32)
        + bfc_ref[...]
    )


# ----------------------------------------------------------------------------
# Jitted end-to-end forward: patchify + cast + fused kernel in one XLA program
# ----------------------------------------------------------------------------
@functools.partial(jax.jit, static_argnames=("patch", "use_max_pool"))
def _forward_impl(x, w_embed, w_fc, b_fc_eff, *, patch, use_max_pool):
    bs, n, ch, w, h = x.shape
    p = patch
    w2, h2 = w // p, h // p
    L = n * w2 * h2
    K = p * p * ch

    # NCHW -> non-overlapping patches (bs*L, K), cast to bf16.  All of this is
    # fused into the single jitted program (no separate host dispatches).
    xt = jnp.transpose(x.reshape(bs * n, ch, w, h), (0, 2, 3, 1))  # (bsn, w, h, ch)
    xt = xt.reshape(bs * n, w2, p, h2, p, ch)
    xt = jnp.transpose(xt, (0, 1, 3, 2, 4, 5))                     # (bsn, w2, h2, p, p, ch)
    patches2d = xt.reshape(bs * L, K).astype(jnp.bfloat16)

    num_classes = w_fc.shape[-1]
    kernel = functools.partial(
        _fused_forward_kernel, bs=bs, L=L, use_max_pool=use_max_pool
    )
    return pl.pallas_call(
        kernel,
        out_shape=jax.ShapeDtypeStruct((bs, num_classes), jnp.float32),
        in_specs=[pl.BlockSpec(memory_space=pltpu.MemorySpace.VMEM)] * 4,
        out_specs=pl.BlockSpec(memory_space=pltpu.MemorySpace.VMEM),
    )(patches2d, w_embed, w_fc, b_fc_eff)


# ----------------------------------------------------------------------------
# Module wrapper
# ----------------------------------------------------------------------------
class MultiInstanceCNNModelRetrainForSwinPallas:
    def __init__(
        self,
        num_classes=1,
        n_instance=3,
        in_ch=4,
        patch=4,
        embed_dim=32,
        use_max_pool=True,
        key=jax.random.PRNGKey(1),
    ):
        self.num_classes = num_classes
        self.n_instance = n_instance
        self.in_ch = in_ch
        self.patch = patch
        self.embed_dim = embed_dim  # == nc (head.in_features of the Swin encoder)
        self.use_max_pool = use_max_pool

        k1, k2, k3, k4 = jax.random.split(key, 4)
        K = in_ch * patch * patch
        C = embed_dim
        # Encoder weights kept in bf16 (native MXU path, half the DMA bytes).
        self.w_embed = (0.02 * jax.random.normal(k1, (K, C))).astype(jnp.bfloat16)
        self.b_embed = (0.02 * jax.random.normal(k2, (1, C))).astype(jnp.float32)
        fc_in = C * 2 if use_max_pool else C
        self.w_fc = (0.02 * jax.random.normal(k3, (fc_in, num_classes))).astype(jnp.float32)
        self.b_fc = (0.02 * jax.random.normal(k4, (1, num_classes))).astype(jnp.float32)

        # Weight prep hoisted to __init__: fold the encoder bias into the fc
        # bias (mean(X+b) = mean(X)+b, max(X+b) = max(X)+b).
        if use_max_pool:
            b_cat = jnp.concatenate([self.b_embed, self.b_embed], axis=1)  # (1, 2C)
        else:
            b_cat = self.b_embed
        self.b_fc_eff = self.b_fc + jnp.dot(b_cat, self.w_fc)

    def __call__(self, x):
        # x: (bs, n, ch, w, h)
        return _forward_impl(
            x, self.w_embed, self.w_fc, self.b_fc_eff,
            patch=self.patch, use_max_pool=self.use_max_pool,
        )

    # pure-JAX reference of the same forward (for verification)
    def reference(self, x):
        bs, n, ch, w, h = x.shape
        p = self.patch
        w2, h2 = w // p, h // p
        xt = jnp.transpose(x.reshape(bs * n, ch, w, h), (0, 2, 3, 1))
        xt = xt.reshape(bs * n, w2, p, h2, p, ch)
        xt = jnp.transpose(xt, (0, 1, 3, 2, 4, 5))
        patches = xt.reshape(bs * n, w2 * h2, p * p * ch)
        feat = (
            jnp.dot(patches.astype(jnp.bfloat16), self.w_embed,
                    preferred_element_type=jnp.float32)
            + self.b_embed
        )  # (bsn, P, C)
        feat = feat.reshape(bs, n * w2, h2, self.embed_dim)
        mean_ = feat.mean(1).mean(1)
        if self.use_max_pool:
            max_ = feat.max(1).max(1)
            cat = jnp.concatenate([mean_, max_], axis=1)
        else:
            cat = mean_
        return jnp.dot(cat, self.w_fc, preferred_element_type=jnp.float32) + self.b_fc


if __name__ == "__main__":
    bs, n, ch, w, h = 2, 3, 4, 16, 16
    key = jax.random.PRNGKey(0)
    x = jax.random.normal(key, (bs, n, ch, w, h), dtype=jnp.float32)

    model = MultiInstanceCNNModelRetrainForSwinPallas(
        num_classes=1, n_instance=n, in_ch=ch, patch=4, embed_dim=32, use_max_pool=True
    )

    out = jax.block_until_ready(model(x))
    assert out.shape == (bs, 1), out.shape

    ref = jax.block_until_ready(model.reference(x))
    assert jnp.allclose(out, ref, atol=1e-2, rtol=1e-2), (out, ref)

    print("KERNEL_OK")
</pallas_src>

<mosaic_0001>
module attributes {stable_mosaic.version = 11 : i64} {
  func.func @_fused_forward_kernel(%arg0: memref<96x64xbf16, #tpu.memory_space<vmem>>, %arg1: memref<64x32xbf16, #tpu.memory_space<vmem>>, %arg2: memref<64x1xf32, #tpu.memory_space<vmem>>, %arg3: memref<1x1xf32, #tpu.memory_space<vmem>>, %arg4: memref<2x1xf32, #tpu.memory_space<vmem>>) attributes {dimension_semantics = [], scalar_prefetch = 0 : i64, scratch_operands = 0 : i64, tpu.core_type = #tpu.core_type<tc>} {
    %c0 = arith.constant 0 : index
    %c0_0 = arith.constant 0 : index
    %0 = vector.load %arg0[%c0, %c0_0] : memref<96x64xbf16, #tpu.memory_space<vmem>>, vector<96x64xbf16>
    %c0_1 = arith.constant 0 : index
    %c0_2 = arith.constant 0 : index
    %1 = vector.load %arg1[%c0_1, %c0_2] : memref<64x32xbf16, #tpu.memory_space<vmem>>, vector<64x32xbf16>
    %cst = arith.constant dense<0.000000e+00> : vector<96x32xf32>
    %2 = tpu.matmul %0, %1, %cst {dimension_numbers = #tpu.dot_dimension_numbers<[1], [0], [0], [1], [0, 0, 1, 1], [], []>} : vector<96x64xbf16>, vector<64x32xbf16>, vector<96x32xf32> -> vector<96x32xf32>
    %3 = vector.shape_cast %2 : vector<96x32xf32> to vector<2x48x32xf32>
    %cst_3 = arith.constant dense<0.000000e+00> : vector<2x32xf32>
    %4 = vector.multi_reduction <add>, %3, %cst_3 [1] : vector<2x48x32xf32> to vector<2x32xf32>
    %cst_4 = arith.constant 0.020833334 : f32
    %5 = vector.broadcast %cst_4 : f32 to vector<2x32xf32>
    %6 = arith.mulf %4, %5 : vector<2x32xf32>
    %cst_5 = arith.constant dense<0xFF800000> : vector<2x32xf32>
    %7 = vector.multi_reduction <maximumf>, %3, %cst_5 [1] : vector<2x48x32xf32> to vector<2x32xf32>
    %8 = tpu.concatenate %6, %7 in 1 : vector<2x32xf32>, vector<2x32xf32> -> vector<2x64xf32>
    %c0_6 = arith.constant 0 : index
    %c0_7 = arith.constant 0 : index
    %9 = vector.load %arg2[%c0_6, %c0_7] : memref<64x1xf32, #tpu.memory_space<vmem>>, vector<64x1xf32>
    %cst_8 = arith.constant dense<0.000000e+00> : vector<2x1xf32>
    %10 = tpu.matmul %8, %9, %cst_8 {dimension_numbers = #tpu.dot_dimension_numbers<[1], [0], [0], [1], [0, 0, 1, 1], [], []>} : vector<2x64xf32>, vector<64x1xf32>, vector<2x1xf32> -> vector<2x1xf32>
    %c0_9 = arith.constant 0 : index
    %c0_10 = arith.constant 0 : index
    %11 = vector.load %arg3[%c0_9, %c0_10] : memref<1x1xf32, #tpu.memory_space<vmem>>, vector<1x1xf32>
    %12 = vector.broadcast %11 : vector<1x1xf32> to vector<2x1xf32>
    %13 = arith.addf %10, %12 : vector<2x1xf32>
    %c0_11 = arith.constant 0 : index
    %c0_12 = arith.constant 0 : index
    %14 = vector.load %arg4[%c0_11, %c0_12] : memref<2x1xf32, #tpu.memory_space<vmem>>, vector<2x1xf32>
    tpu.vector_store %arg4[%c0_11, %c0_12], %13 {strides = array<i32>} : memref<2x1xf32, #tpu.memory_space<vmem>>, vector<2x1xf32>,
    return
  }
}

</mosaic_0001>

<bundles_post_ra>
// kernel: _forward_impl.1
= control target key start
LH: loop header
LB: loop body
LE: loop exit
PB: predicated region body
PF: predicated region fallthrough
CT: control target
= control target key end

     0   :  { %vm94_vm0 = vcmask 523264   ;;  %v468_v10 = vmov 0.0   ;;  %vm194_vm1 = vcmask 261120   ;;  %vm469_vm2 = vmmov 0   ;;  %s597_s1 = inlined_call_operand.vmem [shape: bf16[64,32], index: 1, kind: input, shape index: {}]   ;;  %s598_s0 = inlined_call_operand.vmem [shape: bf16[96,64], index: 0, kind: input, shape index: {}]   ;;  %s599_s2 = inlined_call_operand.vmem [shape: f32[64,1], index: 2, kind: input, shape index: {}]   ;;  %s600_s3 = inlined_call_operand.<no memory space> [shape: f32[1,1], index: 3, kind: input, shape index: {}]   ;;  %s601_s4 = inlined_call_operand.vmem [shape: f32[2,1], index: 4, kind: output, shape index: {}]  }
   0x1   :  { %v458_v0 = vld [vmem:[%s597_s1 + $0x18] sm:$0xff]   ;;  %v459_v1 = vld [vmem:[%s597_s1 + $0x10] sm:$0xff]   ;;  %v460_v2 = vld [vmem:[%s597_s1 + $0x8] sm:$0xff]   ;;  %vm267_vm3 = vcmask 1041409   ;;  %vm365_vm4 = vcmask 1024  }
   0x2   :  { %408 = vmatprep.subr.bf16.mxu0 %v458_v0  ;;  %447 = vmatprep.subr.bf16.mxu1 %v458_v0  ;;  %v462_v3 = vld [vmem:[%s598_s0] sm:$0xff]   ;;  %v463_v4 = vld [vmem:[%s598_s0 + $0x10] sm:$0xff]   ;;  %v464_v6 = vld [vmem:[%s598_s0 + $0x8] sm:$0xff]  }
   0x3   :  { %409 = vmatpush3.bf16.msra.mxu0 %v458_v0  ;;  %451 = vmatpush3.bf16.msra.mxu1 %v458_v0  ;;  %v461_v5 = vld [vmem:[%s597_s1] sm:$0xff]   ;;  %v465_v7 = vld [vmem:[%s598_s0 + $0x18] sm:$0xff]   ;;  %v467_v9 = vld [vmem:[%s598_s0 + $0x28] sm:$0xff]  }
   0x4   :  { %410 = vmatprep.subr.bf16.mxu0 %v459_v1  ;;  %448 = vmatprep.subr.bf16.mxu1 %v459_v1  ;;  %v466_v8 = vld [vmem:[%s598_s0 + $0x20] sm:$0xff]   ;;  %v284_v11 = vld [vmem:[%s599_s2 + $0x38] sm:$0xff]  ;;  %v283_v12 = vld [vmem:[%s599_s2 + $0x30] sm:$0xff] }
   0x5   :  { %416 = vmatprep.mubr.msk.bf16.mxu0 %vm94_vm0, %v462_v3  ;;  %420 = vmatprep.mubr.msk.bf16.mxu1 %vm94_vm0, %v463_v4  ;;  %v282_v13 = vld [vmem:[%s599_s2 + $0x28] sm:$0xff]  ;;  %v281_v14 = vld [vmem:[%s599_s2 + $0x20] sm:$0xff]  ;;  %v280_v15 = vld [vmem:[%s599_s2 + $0x18] sm:$0xff] }
   0x6   :  { %v279_v16 = vld [vmem:[%s599_s2 + $0x10] sm:$0xff]  ;;  %v278_v17 = vld [vmem:[%s599_s2 + $0x8] sm:$0xff] }
   0x7   :  { %411 = vmatpush3.bf16.msra.mxu0 %v459_v1  ;;  %452 = vmatpush3.bf16.msra.mxu1 %v459_v1 }
   0x8   :  { %412 = vmatprep.subr.bf16.mxu0 %v460_v2  ;;  %449 = vmatprep.subr.bf16.mxu1 %v460_v2 }
   0xb   :  { %413 = vmatpush3.bf16.msra.mxu0 %v460_v2  ;;  %453 = vmatpush3.bf16.msra.mxu1 %v460_v2 }
   0xc   :  { %414 = vmatprep.subr.bf16.mxu0 %v461_v5  ;;  %450 = vmatprep.subr.bf16.mxu1 %v461_v5 }
   0xf   :  { %415 = vmatpush3.bf16.msra.mxu0 %v461_v5  ;;  %454 = vmatpush3.bf16.msra.mxu1 %v461_v5 }
  0x10   :  { %428 = vmatprep.subr.mxu1 %v468_v10 }
  0x12   :  { %417 = vmatmul.mubr.msk.bf16.vlgmr.msra.gmra.mxu0 %vm94_vm0, %v464_v6  ;;  %421 = vmatmul.mubr.msk.bf16.vlgmr.msra.gmra.mxu1 %vm94_vm0, %v465_v7 }
  0x13   :  { %424 = vmatprep.mubr.msk.bf16.mxu1 %vm94_vm0, %v466_v8  ;;  %429 = vmatpush3.msra.mxu1 %v284_v11 }
  0x14   :  { %430 = vmatprep.subr.mxu1 %v468_v10 }
  0x15   :  { %431 = vmatpush3.msra.mxu1 %v283_v12 }
  0x16   :  { %432 = vmatprep.subr.mxu1 %v468_v10 }
  0x17   :  { %433 = vmatpush3.msra.mxu1 %v282_v13 }
  0x18   :  { %434 = vmatprep.subr.mxu1 %v468_v10 }
  0x19   :  { %435 = vmatpush3.msra.mxu1 %v281_v14 }
  0x1a   :  { %425 = vmatmul.mubr.msk.bf16.gmra.mxu1 %vm94_vm0, %v467_v9  ;;  %436 = vmatprep.subr.mxu1 %v468_v10 }
  0x1b   :  { %437 = vmatpush3.msra.mxu1 %v280_v15  ;;  %444 = vmatprep.mubr.msk.f32.mxu1 %vm469_vm2, %v468_v10 }
  0x1c   :  { %438 = vmatprep.subr.mxu1 %v468_v10 }
  0x1d   :  { %439 = vmatpush3.msra.mxu1 %v279_v16  ;;  %v277_v16 = vld [vmem:[%s599_s2] sm:$0xff]  ;;  %s470_s2 = smov 32  }
  0x1e   :  { %440 = vmatprep.subr.mxu1 %v468_v10 }
  0x1f   :  { %441 = vmatpush3.msra.mxu1 %v278_v17 }
  0x20   :  { %442 = vmatprep.subr.mxu1 %v468_v10 }
  0x21   :  { %443 = vmatpush3.msra.mxu1 %v277_v16 }
  0xd2   :  { %v418_v18 = vpop.f32.mrf.mxu0  ;;  %v422_v19 = vpop.f32.mrf.mxu1 }
  0xd3   :  { %v233_v22 = vsel %vm194_vm1, %v418_v18, -inf  ;;  %v212_v26 = vsel %vm194_vm1, %v422_v19, 0.0  ;;  %v198_v34 = vsel %vm194_vm1, %v418_v18, 0.0  ;;  %v248_v53 = vsel %vm194_vm1, %v422_v19, -inf }
  0xd4   :  { %v147_v20 = vpop.f32.mrf.mxu0  ;;  %v163_v21 = vpop.f32.mrf.mxu1 }
  0xd5   :  { %v231_v23 = vsel %vm194_vm1, %v147_v20, -inf  ;;  %v195_v27 = vsel %vm194_vm1, %v147_v20, 0.0  ;;  %v237_v40 = vsel %vm194_vm1, %v163_v21, -inf  ;;  %v202_v54 = vsel %vm194_vm1, %v163_v21, 0.0 }
  0xd6   :  { %v419_v24 = vpop.f32.mrf.mxu0  ;;  %v423_v25 = vpop.f32.mrf.mxu1  ;;  %v234_v30 = vmax.f32 %v231_v23, %v233_v22 }
  0xd7   :  { %v235_v28 = vsel %vm194_vm1, %v419_v24, -inf  ;;  %v213_v29 = vsel %vm194_vm1, %v423_v25, 0.0  ;;  %v200_v46 = vsel %vm194_vm1, %v419_v24, 0.0  ;;  %v249_v59 = vsel %vm194_vm1, %v423_v25, -inf }
  0xd8   :  { %v214_v31 = vadd.f32 %v213_v29, %v212_v26  ;;  %v150_v32 = vpop.f32.mrf.mxu0  ;;  %v166_v33 = vpop.f32.mrf.mxu1  ;;  %v238_v42 = vmax.f32 %v234_v30, %v237_v40  ;;  %v9_v24 = vstv %s600_s3 }
  0xd9   :  { %v196_v35 = vsel %vm194_vm1, %v150_v32, 0.0  ;;  %v232_v36 = vsel %vm194_vm1, %v150_v32, -inf  ;;  %v239_v41 = vsel %vm194_vm1, %v166_v33, -inf  ;;  %v204_v60 = vsel %vm194_vm1, %v166_v33, 0.0  ;;  %10 = vst [vmem:[#allocation2] sm:$0x1] %v9_v24 }
  0xda   :  { %v197_v37 = vadd.f32 %v196_v35, %v195_v27  ;;  %v236_v38 = vmax.f32 %v232_v36, %v235_v28  ;;  %v426_v39 = vpop.f32.mrf.mxu1 }
  0xdb   :  { %v219_v3 = vsel %vm194_vm1, %v426_v39, 0.0  ;;  %v254_v4 = vsel %vm194_vm1, %v426_v39, -inf }
  0xdc   :  { %v199_v43 = vadd.f32 %v198_v34, %v197_v37  ;;  %v240_v44 = vmax.f32 %v236_v38, %v239_v41  ;;  %v179_v45 = vpop.f32.mrf.mxu1 }
  0xdd   :  { %v215_v47 = vsel %vm194_vm1, %v179_v45, 0.0  ;;  %v250_v48 = vsel %vm194_vm1, %v179_v45, -inf }
  0xde   :  { %v201_v49 = vadd.f32 %v200_v46, %v199_v43  ;;  %v241_v50 = vmax.f32 %v238_v42, %v240_v44  ;;  %v216_v51 = vadd.f32 %v215_v47, %v214_v31  ;;  %v427_v52 = vpop.f32.mrf.mxu1  ;;  %v251_v57 = vmax.f32 %v248_v53, %v250_v48 }
  0xdf   :  { %v256_v5 = vsel %vm194_vm1, %v427_v52, -inf  ;;  %v221_v11 = vsel %vm194_vm1, %v427_v52, 0.0 }
  0xe0   :  { %v203_v55 = vadd.f32 %v202_v54, %v201_v49  ;;  %v242_v56 = vrot.slane %v241_v50, 4  ;;  %v182_v58 = vpop.f32.mrf.mxu1  ;;  %v255_v7 = vmax.f32 %v251_v57, %v254_v4  ;;  %v387_v42 = vld [vmem:[#allocation2] ss:$0 sm:$0xff] }
  0xe1   :  { %v217_v61 = vsel %vm194_vm1, %v182_v58, 0.0  ;;  %v252_v62 = vsel %vm194_vm1, %v182_v58, -inf }
  0xe2   :  { %v205_v63 = vadd.f32 %v204_v60, %v203_v55  ;;  %v243_v0 = vmax.f32 %v241_v50, %v242_v56  ;;  %v218_v1 = vadd.f32 %v217_v61, %v216_v51  ;;  %v253_v2 = vmax.f32 %v249_v59, %v252_v62 }
  0xe4   :  { %v206_v6 = vrot.slane %v205_v63, 4  ;;  %v220_v8 = vadd.f32 %v219_v3, %v218_v1  ;;  %v257_v9 = vmax.f32 %v253_v2, %v256_v5  ;;  %v244_v13 = vrot.slane %v243_v0, 2 }
  0xe6   :  { %v207_v12 = vadd.f32 %v206_v6, %v205_v63  ;;  %v222_v14 = vadd.f32 %v221_v11, %v220_v8  ;;  %v258_v15 = vmax.f32 %v255_v7, %v257_v9  ;;  %v245_v23 = vmax.f32 %v243_v0, %v244_v13 }
  0xe8   :  { %v208_v17 = vrot.slane %v207_v12, 2  ;;  %v223_v18 = vrot.slane %v222_v14, 4  ;;  %v259_v19 = vrot.slane %v258_v15, 4  ;;  %v246_v29 = vrot.slane %v245_v23, 1 }
  0xea   :  { %v209_v20 = vadd.f32 %v208_v17, %v207_v12  ;;  %v224_v21 = vadd.f32 %v223_v18, %v222_v14  ;;  %v260_v22 = vmax.f32 %v258_v15, %v259_v19  ;;  %v247_v10 = vmax.f32 %v245_v23, %v246_v29 }
  0xec   :  { %v210_v25 = vrot.slane %v209_v20, 1  ;;  %v225_v26 = vrot.slane %v224_v21, 2  ;;  %v261_v27 = vrot.slane %v260_v22, 2 }
  0xee   :  { %v226_v28 = vadd.f32 %v225_v26, %v224_v21  ;;  %v262_v30 = vmax.f32 %v260_v22, %v261_v27  ;;  %v211_v31 = vadd.f32 %v210_v25, %v209_v20 }
  0xf0   :  { %v263_v32 = vrot.slane %v262_v30, 1  ;;  %v227_v33 = vrot.slane %v226_v28, 1  ;;  %v229_v37 = vmul.f32 0.020833334, %v211_v31 }
  0xf2   :  { %v264_v34 = vmax.f32 %v262_v30, %v263_v32  ;;  %v228_v35 = vadd.f32 %v227_v33, %v226_v28 }
  0xf4   :  { %v272_v36 = vsel %vm267_vm3, %v264_v34, %v247_v10  ;;  %v230_v38 = vmul.f32 0.020833334, %v228_v35 }
  0xf5   :  { %273 = vrot.lane.b32.xlu0 %v272_v36, %s470_s2 }
  0xf6   :  { %v268_v39 = vsel %vm267_vm3, %v230_v38, %v229_v37 }
 0x167   :  { %v274_v40 = vpop.permute.xlu0 %273 }
 0x168   :  { %v276_v41 = vsel %vm194_vm1, %v268_v39, %v274_v40 }
 0x169   :  { %445 = vmatmul.mubr.msk.f32.vlgmr.msra.gmra.mxu1 %vm94_vm0, %v276_v41 }
 0x229   :  { %v361_v43 = vpop.f32.mrf.mxu1 }
 0x22a   :  { %v362_v44 = vadd.f32 %v387_v42, %v361_v43 }
 0x22b   :  { %v446_v45 = vpop.f32.mrf.mxu1 }
 0x22c   :  { %366 = vst.msk [vmem:[%s601_s4] sm:$0x3] %vm365_vm4, %v362_v44 }

</bundles_post_ra>
